<compile_context>
chip_gen: v5e
topology: v5e:2x2
jax: 0.10.0
libtpu: 0.0.40
codegen_flags: <defaults>
</compile_context>

<pallas_src>
import numpy as np
import jax
import jax.numpy as jnp
from jax.experimental import pallas as pl
from jax.experimental.pallas import tpu as pltpu


# ----------------------------- Pallas kernels ------------------------------ #
def _gridmask_kernel(x_ref, m_ref, o_ref):
    # x_ref: (TR, TC) block of flattened planes; m_ref: (1, TC) mask row.
    o_ref[...] = x_ref[...] * m_ref[...]


def _gridmask_offset_kernel(x_ref, m_ref, b_ref, o_ref):
    # b_ref already holds offset * (1 - mask): one mul + one add per element.
    o_ref[...] = x_ref[...] * m_ref[...] + b_ref[...]


# ------------------------------ tiling policy ------------------------------ #
def _pick_tiles(num_rows, num_cols, itemsize, target_bytes=2 << 20):
    """Pick (row_tile, col_tile) for the flattened (N*C, H*W) slab.

    Keeps each x/out tile around `target_bytes` so the pipeline's double
    buffers (2 in + 2 out) plus the resident mask stay well inside the scoped
    VMEM limit on v5e (16 MiB default), v6e (32 MiB) and v7x (64 MiB physical).
    Last-two-dim blocks are either multiples of (8, 128) or the full extent.
    """
    row_bytes = num_cols * itemsize
    if row_bytes <= target_bytes or num_cols % 128 != 0:
        # Full lane extent (also the required fallback when H*W isn't a
        # multiple of 128 — then the block must equal the full array dim).
        tc = num_cols
    else:
        tc = max(128, ((target_bytes // itemsize) // 128) * 128)
        tc = min(tc, num_cols)

    tile_row_bytes = tc * itemsize
    tr = max(1, target_bytes // tile_row_bytes)
    if tr >= num_rows:
        tr = num_rows                      # full extent: always legal
    else:
        tr = min(max(8, (tr // 8) * 8), num_rows)  # multiple of 8
    return int(tr), int(tc)


# ------------------------------ pallas wrapper ------------------------------ #
def gridmask_apply(x, mask, bias=None, *, target_tile_bytes=2 << 20):
    """out = x * mask (+ bias), with mask/bias of shape (H, W) broadcast over (N, C).

    `bias` must already be offset * (1 - mask) (pre-folded), or None.
    """
    n, c, h, w = x.shape
    rows, cols = n * c, h * w
    xf = x.reshape(rows, cols)
    mf = mask.reshape(1, cols).astype(x.dtype)

    tr, tc = _pick_tiles(rows, cols, jnp.dtype(x.dtype).itemsize, target_tile_bytes)
    grid = (pl.cdiv(rows, tr), pl.cdiv(cols, tc))

    x_spec = pl.BlockSpec((tr, tc), lambda i, j: (i, j))
    m_spec = pl.BlockSpec((1, tc), lambda i, j: (0, j))   # same row block every step

    if bias is None:
        kernel = _gridmask_kernel
        in_specs = [x_spec, m_spec]
        args = (xf, mf)
    else:
        kernel = _gridmask_offset_kernel
        bf = bias.reshape(1, cols).astype(x.dtype)
        in_specs = [x_spec, m_spec, m_spec]
        args = (xf, mf, bf)

    out = pl.pallas_call(
        kernel,
        out_shape=jax.ShapeDtypeStruct((rows, cols), x.dtype),
        grid=grid,
        in_specs=in_specs,
        out_specs=x_spec,
        compiler_params=pltpu.CompilerParams(
            dimension_semantics=("parallel", "parallel"),  # fully elementwise
            vmem_limit_bytes=32 * 1024 * 1024,             # raise v5e's 16 MiB default
        ),
    )(*args)
    return out.reshape(n, c, h, w)


# ----------------------------- mask construction ---------------------------- #
def make_gridmask(h, w, *, use_h=True, use_w=True, rotate=1, ratio=0.5, mode=0, rng=None):
    """Reproduces the numpy mask construction of GridMask.forward deterministically."""
    hh = int(1.5 * h)
    ww = int(1.5 * w)
    d = int(rng.randint(2, h))
    l = min(max(int(d * ratio + 0.5), 1), d - 1)
    mask = np.ones((hh, ww), np.float32)
    st_h = int(rng.randint(d))
    st_w = int(rng.randint(d))
    if use_h:
        for i in range(hh // d):
            s = d * i + st_h
            t = min(s + l, hh)
            mask[s:t, :] *= 0
    if use_w:
        for i in range(ww // d):
            s = d * i + st_w
            t = min(s + l, ww)
            mask[:, s:t] *= 0
    r = int(rng.randint(rotate))  # with rotate=1 (default), r == 0 -> identity rotation
    # TODO(synk): PIL Image.rotate(r) for r > 0 has no clean Pallas/JAX equivalent here;
    #             with the default rotate=1 the rotation is always the identity.
    mask = mask[(hh - h) // 2:(hh - h) // 2 + h, (ww - w) // 2:(ww - w) // 2 + w]
    if mode == 1:
        mask = 1.0 - mask
    return np.ascontiguousarray(mask, dtype=np.float32)


class GridMask:
    """JAX/Pallas port of the PyTorch GridMask module (forward semantics)."""

    def __init__(self, use_h, use_w, rotate=1, offset=False, ratio=0.5, mode=0, prob=1.0,
                 seed=0):
        self.use_h = use_h
        self.use_w = use_w
        self.rotate = rotate
        self.offset = offset
        self.ratio = ratio
        self.mode = mode
        self.st_prob = prob
        self.prob = prob
        self.training = True
        self._rng = np.random.RandomState(seed)  # deterministic replacement for np.random

    def set_prob(self, epoch, max_epoch):
        self.prob = self.st_prob * epoch / max_epoch

    def __call__(self, x):
        if self._rng.rand() > self.prob or not self.training:
            return x
        n, c, h, w = x.shape
        mask_np = make_gridmask(h, w, use_h=self.use_h, use_w=self.use_w,
                                rotate=self.rotate, ratio=self.ratio, mode=self.mode,
                                rng=self._rng)
        mask = jnp.asarray(mask_np, dtype=x.dtype)
        if self.offset:
            off_np = (2.0 * (self._rng.rand(h, w) - 0.5)).astype(np.float32)
            # Pre-fold offset * (1 - mask) on the tiny (H, W) plane so the kernel
            # body is a single mul+add and needs no (1 - m) recompute per step.
            bias_np = (off_np * (1.0 - mask_np)).astype(np.float32)
            bias = jnp.asarray(bias_np, dtype=x.dtype)
            return gridmask_apply(x, mask, bias)
        return gridmask_apply(x, mask)


# ----------------------------------- main ----------------------------------- #
if __name__ == "__main__":
    key = jax.random.PRNGKey(0)
    n, c, h, w = 2, 4, 16, 16
    x = jax.random.normal(key, (n, c, h, w), dtype=jnp.float32)

    # ---- case 1: no offset, mode=1 (2-input kernel) ----
    gm = GridMask(use_h=True, use_w=True, rotate=1, offset=False, ratio=0.5, mode=1,
                  prob=1.0, seed=0)
    out = jax.block_until_ready(gm(x))

    rng_ref = np.random.RandomState(0)
    assert rng_ref.rand() <= 1.0  # prob gate (prob=1.0 -> always apply)
    mask_ref = make_gridmask(h, w, use_h=True, use_w=True, rotate=1, ratio=0.5, mode=1,
                             rng=rng_ref)
    ref = np.asarray(x) * mask_ref[None, None, :, :]
    np.testing.assert_allclose(np.asarray(out), ref, rtol=1e-6, atol=1e-6)

    # ---- case 2: offset=True, mode=0 (3-input fused mul+add kernel) ----
    gm2 = GridMask(use_h=True, use_w=True, rotate=1, offset=True, ratio=0.5, mode=0,
                   prob=1.0, seed=1)
    out2 = jax.block_until_ready(gm2(x))

    rng_ref2 = np.random.RandomState(1)
    assert rng_ref2.rand() <= 1.0
    mask_ref2 = make_gridmask(h, w, use_h=True, use_w=True, rotate=1, ratio=0.5, mode=0,
                              rng=rng_ref2)
    off_ref2 = (2.0 * (rng_ref2.rand(h, w) - 0.5)).astype(np.float32)
    ref2 = (np.asarray(x) * mask_ref2[None, None, :, :]
            + off_ref2[None, None, :, :] * (1.0 - mask_ref2[None, None, :, :]))
    np.testing.assert_allclose(np.asarray(out2), ref2, rtol=1e-6, atol=1e-6)

    print("KERNEL_OK")
</pallas_src>

<mosaic_0001>
module attributes {stable_mosaic.version = 11 : i64} {
  func.func @_gridmask_kernel(%arg0: i32, %arg1: i32, %arg2: memref<8x256xf32, #tpu.memory_space<vmem>>, %arg3: memref<1x256xf32, #tpu.memory_space<vmem>>, %arg4: memref<8x256xf32, #tpu.memory_space<vmem>>) attributes {dimension_semantics = [#tpu.dimension_semantics<parallel>, #tpu.dimension_semantics<parallel>], iteration_bounds = array<i64: 1, 1>, scalar_prefetch = 0 : i64, scratch_operands = 0 : i64, tpu.core_type = #tpu.core_type<tc>, window_params = [{transform_indices = @transform_0, window_bounds = array<i64: 8, 256>}, {transform_indices = @transform_1, window_bounds = array<i64: 1, 256>}, {transform_indices = @transform_2, window_bounds = array<i64: 8, 256>}]} {
    %c0 = arith.constant 0 : index
    %c0_0 = arith.constant 0 : index
    %0 = vector.load %arg2[%c0, %c0_0] : memref<8x256xf32, #tpu.memory_space<vmem>>, vector<8x256xf32>
    %c0_1 = arith.constant 0 : index
    %c0_2 = arith.constant 0 : index
    %1 = vector.load %arg3[%c0_1, %c0_2] : memref<1x256xf32, #tpu.memory_space<vmem>>, vector<1x256xf32>
    %2 = vector.broadcast %1 : vector<1x256xf32> to vector<8x256xf32>
    %3 = arith.mulf %0, %2 : vector<8x256xf32>
    %c0_3 = arith.constant 0 : index
    %c0_4 = arith.constant 0 : index
    %4 = vector.load %arg4[%c0_3, %c0_4] : memref<8x256xf32, #tpu.memory_space<vmem>>, vector<8x256xf32>
    tpu.vector_store %arg4[%c0_3, %c0_4], %3 {strides = array<i32>} : memref<8x256xf32, #tpu.memory_space<vmem>>, vector<8x256xf32>,
    return
  }
  func.func @transform_0(%arg0: i32, %arg1: i32) -> (i32, i32) {
    %c0_i32 = arith.constant 0 : i32
    return %arg0, %arg1 : i32, i32
  }
  func.func @transform_1(%arg0: i32, %arg1: i32) -> (i32, i32) {
    %c0_i32 = arith.constant 0 : i32
    %c0_i32_0 = arith.constant 0 : i32
    return %c0_i32, %arg1 : i32, i32
  }
  func.func @transform_2(%arg0: i32, %arg1: i32) -> (i32, i32) {
    %c0_i32 = arith.constant 0 : i32
    return %arg0, %arg1 : i32, i32
  }
}

</mosaic_0001>

<bundles_post_ra>
// kernel: tpu_custom_call.1
= control target key start
LH: loop header
LB: loop body
LE: loop exit
PB: predicated region body
PF: predicated region fallthrough
CT: control target
= control target key end

     0   :  { %7 = vsyncpa [#allocation3], 0  ;;  %s178_s0 = inlined_call_operand.hbm [shape: f32[8,256], index: 0, kind: input, shape index: {}]   ;;  %s179_s1 = inlined_call_operand.hbm [shape: f32[1,256], index: 1, kind: input, shape index: {}]   ;;  %s180_s2 = inlined_call_operand.hbm [shape: f32[8,256], index: 2, kind: output, shape index: {}]  }
   0x1   :  { %8 = vsyncpa [#allocation6], 0 }
   0x2   :  { %9 = vsyncpa [#allocation4], 0  ;;  %s15_s11 = sshll.u32 %s178_s0, 4  ;;  %s151_s12 = smov [#allocation2]   ;;  %s16_s11 = int_to_ptr.hbm [resolvable:$true] %s15_s11 }
   0x3   :  { %s17_s13 = sshll.u32 %s151_s12, 4  ;;  %s26_s16 = sshll.u32 %s179_s1, 4  ;;  %s18_s13 = int_to_ptr.vmem [resolvable:$true] %s17_s13  ;;  %s27_s16 = int_to_ptr.hbm [resolvable:$true] %s26_s16 }
   0x4   :  { %20 = dma.hbm_to_vmem [thread:$0]  %s16_s11, 256, %s18_s13, [#allocation3]  }
   0x5   :  { %s152_s17 = smov [#allocation5]  }
   0x6   :  { %s28_s18 = sshll.u32 %s152_s17, 4  ;;  %s29_s18 = int_to_ptr.vmem [resolvable:$true] %s28_s18 }
   0x7   :  { %31 = dma.hbm_to_vmem [thread:$0]  %s27_s16, 32, %s29_s18, [#allocation6]  }
   0x8   :  { %145 = dma.done.wait [#allocation3], 256  }
   0x9   :  { %146 = vsyncadd [#allocation3], 4294967040 }
   0xa   :  { %147 = dma.done.wait [#allocation6], 32  }
   0xb   :  { %148 = vsyncadd [#allocation6], 4294967264  ;;  %v40_v0 = vld [vmem:[#allocation2] sm:$0xff]  ;;  %v42_v1 = vld [vmem:[#allocation5] sm:$0x3]  ;;  %s153_s0 = smov [#allocation7]  }
   0xc   :  { %v41_v2 = vld [vmem:[#allocation2 + $0x8] sm:$0xff]  ;;  %v44_v3 = vperm.slane %v42_v1, 0  ;;  %v45_v4 = vperm.slane %v42_v1, 1  ;;  %s57_s19 = sshll.u32 %s153_s0, 4  ;;  %s59_s1 = sshll.u32 %s180_s2, 4  ;;  %s58_s19 = int_to_ptr.vmem [resolvable:$true] %s57_s19  ;;  %s60_s1 = int_to_ptr.hbm [resolvable:$true] %s59_s1 }
   0xe   :  { %v48_v5 = vmul.f32 %v44_v3, %v40_v0  ;;  %v49_v6 = vmul.f32 %v45_v4, %v41_v2 }
  0x10   :  { %50 = vst [vmem:[#allocation7] sm:$0xff] %v48_v5 }
  0x11   :  { %51 = vst [vmem:[#allocation7 + $0x8] sm:$0xff] %v49_v6 }
  0x12   :  { %62 = dma.vmem_to_hbm [thread:$0]  %s58_s19, 256, %s60_s1, [#allocation4]  }
  0x13   :  { %149 = dma.done.wait [#allocation4], 256  }
  0x14   :  { %150 = vsyncadd [#allocation4], 4294967040 }
  0x15   :  { %67 = vsyncpa [#allocation3], 1 }
  0x16   :  { %68 = vsyncpa [#allocation6], 1 }
  0x17   :  { %69 = vsyncpa [#allocation4], 1 }

</bundles_post_ra>
